<compile_context>
chip_gen: v5e
topology: v5e:2x2
jax: 0.10.0
libtpu: 0.0.40
codegen_flags: <defaults>
</compile_context>

<pallas_src>
import functools

import jax
import jax.numpy as jnp
from jax.experimental import pallas as pl
from jax.experimental.pallas import tpu as pltpu


# --------------------------------------------------------------------------- #
# Kernels
# --------------------------------------------------------------------------- #
def _fused_kernel(m_ref, x_ref, o_ref, *, precision):
    # x_ref: (rib, W); m_ref: (W, S*S*W) resident 0/1; o_ref: (rib, S*S*W).
    o_ref[...] = jnp.dot(
        x_ref[...], m_ref[...],
        precision=precision, preferred_element_type=jnp.float32,
    ).astype(o_ref.dtype)


def _tiled_kernel(r_ref, x_ref, o_ref, t_ref, *, precision):
    # r_ref: (wib, wib*S) resident 0/1; x_ref: (rib, wib) resident across s;
    # o_ref: (rib, wib*S) -> the s-th row copy; t_ref: VMEM scratch.
    @pl.when(pl.program_id(2) == 0)
    def _():
        t_ref[...] = jnp.dot(
            x_ref[...], r_ref[...],
            precision=precision, preferred_element_type=jnp.float32,
        ).astype(t_ref.dtype)

    o_ref[...] = t_ref[...]


# --------------------------------------------------------------------------- #
# Helpers
# --------------------------------------------------------------------------- #
def _lane_rep_matrix(w: int, s: int, dtype) -> jax.Array:
    # (w, w*s): (x @ R)[:, v] = x[:, v // s]
    src = jnp.arange(w)[:, None]
    dst = jnp.arange(w * s)[None, :]
    return (dst // s == src).astype(dtype)


def _fused_rep_matrix(w: int, s: int, dtype) -> jax.Array:
    # (w, s*s*w): (x @ M)[:, j] = x[:, (j % (w*s)) // s]  (lane upsample, tiled s times)
    wo = w * s
    src = jnp.arange(w)[:, None]
    dst = jnp.arange(s * wo)[None, :]
    return ((dst % wo) // s == src).astype(dtype)


def _largest_divisor(n: int, max_val: int, align: int):
    for d in range(min(n, max_val), 0, -1):
        if n % d == 0 and d % align == 0:
            return d
    return None


def _pick_row_block(rows: int, max_rows: int, itemsize: int):
    # Prefer dtype sublane-packing alignment (8 f32 / 16 bf16), fall back to 8.
    packed = max(1, 32 // itemsize)
    for align in (packed, 8):
        d = _largest_divisor(rows, max_rows, align)
        if d is not None:
            return d
    return None


def _vmem_capacity_bytes() -> int:
    try:
        return int(pltpu.get_tpu_info().vmem_capacity_bytes)
    except Exception:
        return 64 * 1024 * 1024  # assume the smallest generation (v7x)


def _choose_row_block(rows, out_row_bytes, in_row_bytes, resident_bytes,
                      extra_row_bytes, out_tile_bytes, vmem_cap, itemsize):
    max_rib = max(out_tile_bytes // max(out_row_bytes, 1), 1)
    rib = _pick_row_block(rows, max_rib, itemsize)
    if rib is not None:
        return rib
    # No aligned divisor: try the whole row axis, but only if it fits VMEM.
    full = (2 * rows * (out_row_bytes + in_row_bytes)
            + rows * extra_row_bytes + 2 * resident_bytes)
    if full <= (vmem_cap * 3) // 4:
        return rows
    # TODO(synk): ragged row blocks (pl.cdiv grid + masked tail) for awkward N*C*H.
    raise NotImplementedError(
        f"up_down_sampling: no VMEM-feasible row blocking for N*C*H={rows}")


# --------------------------------------------------------------------------- #
# Public entry point
# --------------------------------------------------------------------------- #
def up_down_sampling(x: jax.Array, size) -> jax.Array:
    """Equivalent of UpDownSampling(size).forward(x) for integer scale factors.

    x: (N, C, H, W) floating array.  Returns (N, C, H*size, W*size).
    """
    if isinstance(size, float) and size.is_integer():
        size = int(size)
    if not (isinstance(size, int) and size >= 1):
        # TODO(synk): non-integer / tuple scale factors and the downsampling half
        # of F.interpolate(mode='nearest') are not implemented.
        raise NotImplementedError("only integer scale_factor >= 1 is supported")
    if not jnp.issubdtype(x.dtype, jnp.floating):
        # TODO(synk): integer dtypes would need a non-MXU replication path.
        raise NotImplementedError("only floating dtypes are supported")

    N, C, H, W = x.shape
    S = size
    Wo = W * S
    rows = N * C * H                       # each output "super-row" maps to one input row
    itemsize = jnp.dtype(x.dtype).itemsize
    precision = (jax.lax.Precision.HIGHEST
                 if x.dtype == jnp.float32 else None)

    vmem_cap = _vmem_capacity_bytes()
    out_tile_bytes = (8 << 20) if vmem_cap >= (96 << 20) else (4 << 20)

    # Free, row-major views: x -> (rows, W); out -> (rows, S*Wo).
    x2 = x.reshape(rows, W)
    out_shape = jax.ShapeDtypeStruct((rows, S * Wo), x.dtype)

    fused_m_bytes = W * (S * Wo) * itemsize
    if W <= 128 and fused_m_bytes <= (8 << 20):
        mode = "fused"
    elif W % 128 == 0:
        mode = "tiled"
    elif fused_m_bytes <= min(16 << 20, vmem_cap // 4):
        # TODO(synk): ragged W tiling for large W not divisible by 128; this
        # fallback keeps one full-width fused matmul (larger contraction dim).
        mode = "fused"
    else:
        raise NotImplementedError(
            f"W={W} is too large and not 128-divisible for this kernel")

    if mode == "fused":
        out_w = S * Wo                                  # full output super-row width
        rib = _choose_row_block(
            rows, out_w * itemsize, W * itemsize, fused_m_bytes, 0,
            out_tile_bytes, vmem_cap, itemsize)
        m = _fused_rep_matrix(W, S, x.dtype)

        est = 2 * rib * (W + out_w) * itemsize + 2 * fused_m_bytes + (2 << 20)
        vmem_limit = int(min(max(est, 16 << 20), (vmem_cap * 7) // 8))

        out2 = pl.pallas_call(
            functools.partial(_fused_kernel, precision=precision),
            out_shape=out_shape,
            grid=(rows // rib,),
            in_specs=[
                pl.BlockSpec((W, out_w), lambda i: (0, 0)),      # resident M
                pl.BlockSpec((rib, W), lambda i: (i, 0)),
            ],
            out_specs=pl.BlockSpec((rib, out_w), lambda i: (i, 0)),
            compiler_params=pltpu.CompilerParams(
                dimension_semantics=("parallel",),
                vmem_limit_bytes=vmem_limit,
            ),
        )(m, x2)

    else:  # mode == "tiled"
        wib = 128                                        # contraction cap (safe on v5e f32)
        wob = wib * S
        wblocks = W // wib
        r_bytes = wib * wob * itemsize

        rib = _choose_row_block(
            rows, wob * itemsize, wib * itemsize, r_bytes, wob * itemsize,
            out_tile_bytes, vmem_cap, itemsize)
        r = _lane_rep_matrix(wib, S, x.dtype)

        est = (2 * rib * (wib + wob) * itemsize + rib * wob * itemsize
               + 2 * r_bytes + (2 << 20))
        vmem_limit = int(min(max(est, 16 << 20), (vmem_cap * 7) // 8))

        out2 = pl.pallas_call(
            functools.partial(_tiled_kernel, precision=precision),
            out_shape=out_shape,
            grid=(rows // rib, wblocks, S),
            in_specs=[
                pl.BlockSpec((wib, wob), lambda i, j, s: (0, 0)),   # resident R
                pl.BlockSpec((rib, wib), lambda i, j, s: (i, j)),   # resident across s
            ],
            out_specs=pl.BlockSpec(
                (rib, wob), lambda i, j, s, _wb=wblocks: (i, s * _wb + j)),
            scratch_shapes=[pltpu.VMEM((rib, wob), x.dtype)],
            compiler_params=pltpu.CompilerParams(
                dimension_semantics=("parallel", "parallel", "arbitrary"),
                vmem_limit_bytes=vmem_limit,
            ),
        )(r, x2)

    return out2.reshape(N, C, H * S, Wo)


# --------------------------------------------------------------------------- #
# Self-test
# --------------------------------------------------------------------------- #
if __name__ == "__main__":
    key = jax.random.PRNGKey(0)
    N, C, H, W = 2, 4, 16, 16
    size = 2  # the module's `size` (scale factor)

    # Un-snapped float32: validates full-mantissa exactness of the 0/1-weight
    # replication matmul (precision=HIGHEST on the f32 path).
    x = jax.random.normal(key, (N, C, H, W), dtype=jnp.float32)

    out = jax.block_until_ready(up_down_sampling(x, size))

    ref = jnp.repeat(jnp.repeat(x, size, axis=2), size, axis=3)
    assert out.shape == (N, C, H * size, W * size), out.shape
    assert out.dtype == x.dtype
    assert jnp.allclose(out, ref, rtol=1e-6, atol=1e-6), (
        "mismatch vs reference nearest upsampling")

    print("KERNEL_OK")
</pallas_src>

<mosaic_0001>
module attributes {stable_mosaic.version = 11 : i64} {
  func.func @_fused_kernel(%arg0: i32, %arg1: memref<16x64xf32, #tpu.memory_space<vmem>>, %arg2: memref<128x16xf32, #tpu.memory_space<vmem>>, %arg3: memref<128x64xf32, #tpu.memory_space<vmem>>) attributes {dimension_semantics = [#tpu.dimension_semantics<parallel>], iteration_bounds = array<i64: 1>, scalar_prefetch = 0 : i64, scratch_operands = 0 : i64, tpu.core_type = #tpu.core_type<tc>, window_params = [{pipeline_mode = #tpu.pipeline_mode<synchronous>, transform_indices = @transform_0, window_bounds = array<i64: 16, 64>}, {transform_indices = @transform_1, window_bounds = array<i64: 128, 16>}, {transform_indices = @transform_2, window_bounds = array<i64: 128, 64>}]} {
    %c0 = arith.constant 0 : index
    %c0_0 = arith.constant 0 : index
    %0 = vector.load %arg2[%c0, %c0_0] : memref<128x16xf32, #tpu.memory_space<vmem>>, vector<128x16xf32>
    %c0_1 = arith.constant 0 : index
    %c0_2 = arith.constant 0 : index
    %1 = vector.load %arg1[%c0_1, %c0_2] : memref<16x64xf32, #tpu.memory_space<vmem>>, vector<16x64xf32>
    %cst = arith.constant dense<0.000000e+00> : vector<128x64xf32>
    %2 = tpu.matmul %0, %1, %cst {dimension_numbers = #tpu.dot_dimension_numbers<[1], [0], [0], [1], [0, 0, 1, 1], [], []>, precision = #tpu.contract_precision<fp32>} : vector<128x16xf32>, vector<16x64xf32>, vector<128x64xf32> -> vector<128x64xf32>
    %c0_3 = arith.constant 0 : index
    %c0_4 = arith.constant 0 : index
    %3 = vector.load %arg3[%c0_3, %c0_4] : memref<128x64xf32, #tpu.memory_space<vmem>>, vector<128x64xf32>
    tpu.vector_store %arg3[%c0_3, %c0_4], %2 {strides = array<i32>} : memref<128x64xf32, #tpu.memory_space<vmem>>, vector<128x64xf32>,
    return
  }
  func.func @transform_0(%arg0: i32) -> (i32, i32) {
    %c0_i32 = arith.constant 0 : i32
    %c0_i32_0 = arith.constant 0 : i32
    %c0_i32_1 = arith.constant 0 : i32
    return %c0_i32, %c0_i32_0 : i32, i32
  }
  func.func @transform_1(%arg0: i32) -> (i32, i32) {
    %c0_i32 = arith.constant 0 : i32
    %c0_i32_0 = arith.constant 0 : i32
    return %arg0, %c0_i32 : i32, i32
  }
  func.func @transform_2(%arg0: i32) -> (i32, i32) {
    %c0_i32 = arith.constant 0 : i32
    %c0_i32_0 = arith.constant 0 : i32
    return %arg0, %c0_i32 : i32, i32
  }
}

</mosaic_0001>

<bundles_post_ra>
// kernel: tpu_custom_call.1
= control target key start
LH: loop header
LB: loop body
LE: loop exit
PB: predicated region body
PF: predicated region fallthrough
CT: control target
= control target key end

     0   :  { %vm29_vm0 = vcmask 130048   ;;  %vm702_vm1 = vcmask 523264   ;;  %s1178_s0 = inlined_call_operand.vmem [shape: f32[16,64], index: 0, kind: input, shape index: {}]   ;;  %s1179_s1 = inlined_call_operand.vmem [shape: f32[128,16], index: 1, kind: input, shape index: {}]   ;;  %s1180_s2 = inlined_call_operand.vmem [shape: f32[128,64], index: 2, kind: output, shape index: {}]  }
   0x1   :  { %v28_v0 = vld [vmem:[%s1178_s0 + $0x8] sm:$0xff]  ;;  %v27_v1 = vld [vmem:[%s1178_s0] sm:$0xff]  ;;  %v21_v8 = vld [vmem:[%s1179_s1 + $0x50] sm:$0xff] }
   0x2   :  { %v19_v2 = vld [vmem:[%s1179_s1 + $0x40] sm:$0xff]  ;;  %v751_v3 = vand.u32 4294901760, %v28_v0  ;;  %v753_v4 = vand.u32 4294901760, %v27_v1  ;;  %v20_v6 = vld [vmem:[%s1179_s1 + $0x48] sm:$0xff]  ;;  %v61_v18 = vsel %vm29_vm0, %v21_v8, 0  ;;  %v13_v33 = vld [vmem:[%s1179_s1 + $0x10] sm:$0xff] }
   0x3   :  { %v55_v5 = vsel %vm29_vm0, %v19_v2, 0  ;;  %v11_v7 = vld [vmem:[%s1179_s1] sm:$0xff]  ;;  %v58_v10 = vsel %vm29_vm0, %v20_v6, 0  ;;  %v12_v12 = vld [vmem:[%s1179_s1 + $0x8] sm:$0xff]  ;;  %v801_v31 = vand.u32 4294901760, %v61_v18  ;;  %v22_v39 = vld [vmem:[%s1179_s1 + $0x58] sm:$0xff] }
   0x4   :  { %v765_v9 = vand.u32 4294901760, %v55_v5  ;;  %v31_v11 = vsel %vm29_vm0, %v11_v7, 0  ;;  %723 = vmatpush.msra.mxu2 %v751_v3  ;;  %v240_v13 = vsub.f32 %v28_v0, %v751_v3  ;;  %v246_v14 = vsub.f32 %v27_v1, %v753_v4  ;;  %93 = vmatpush.msra.mxu0 %v751_v3  ;;  %v14_v45 = vld [vmem:[%s1179_s1 + $0x18] sm:$0xff]  ;;  %v23_v55 = vld [vmem:[%s1179_s1 + $0x60] sm:$0xff] }
   0x5   :  { %v776_v15 = vand.u32 4294901760, %v58_v10  ;;  %v778_v16 = vand.u32 4294901760, %v31_v11  ;;  %v34_v19 = vsel %vm29_vm0, %v12_v12, 0  ;;  %v37_v41 = vsel %vm29_vm0, %v13_v33, 0  ;;  %v15_v59 = vld [vmem:[%s1179_s1 + $0x20] sm:$0xff] }
   0x6   :  { %v781_v17 = vsub.f32 %v55_v5, %v765_v9  ;;  %724 = vmatpush.msra.mxu2 %v753_v4  ;;  %v241_v20 = vand.u32 4294901760, %v240_v13  ;;  %v247_v21 = vand.u32 4294901760, %v246_v14  ;;  %95 = vmatpush.msra.mxu0 %v753_v4  ;;  %v794_v25 = vand.u32 4294901760, %v34_v19  ;;  %v24_v5 = vld [vmem:[%s1179_s1 + $0x68] sm:$0xff] }
   0x7   :  { %v787_v22 = vsub.f32 %v58_v10, %v776_v15  ;;  %v791_v23 = vsub.f32 %v31_v11, %v778_v16  ;;  %v821_v43 = vsub.f32 %v61_v18, %v801_v31  ;;  %v823_v44 = vand.u32 4294901760, %v37_v41  ;;  %v16_v10 = vld [vmem:[%s1179_s1 + $0x28] sm:$0xff] }
   0x8   :  { %v162_v24 = vand.u32 4294901760, %v781_v17  ;;  %332 = vmatpush.msrb.mxu2 %v240_v13  ;;  %v242_v26 = vsub.f32 %v240_v13, %v241_v20  ;;  %v248_v27 = vsub.f32 %v246_v14, %v247_v21  ;;  %549 = vmatpush.msrb.mxu0 %v241_v20  ;;  %v804_v32 = vsub.f32 %v34_v19, %v794_v25 }
   0x9   :  { %v98_v28 = vand.u32 4294901760, %v791_v23  ;;  %v170_v30 = vand.u32 4294901760, %v787_v22  ;;  %v64_v46 = vsel %vm29_vm0, %v22_v39, 0  ;;  %v834_v48 = vsub.f32 %v37_v41, %v823_v44 }
   0xa   :  { %v163_v29 = vsub.f32 %v781_v17, %v162_v24  ;;  %335 = vmatpush.msrb.mxu2 %v246_v14  ;;  %v243_v34 = vand.u32 4294901760, %v242_v26  ;;  %v249_v35 = vand.u32 4294901760, %v248_v27  ;;  %553 = vmatpush.msrb.mxu0 %v247_v21  ;;  %v106_v38 = vand.u32 4294901760, %v804_v32  ;;  %v25_v27 = vld [vmem:[%s1179_s1 + $0x70] sm:$0xff] }
   0xb   :  { %v99_v36 = vsub.f32 %v791_v23, %v98_v28  ;;  %v171_v42 = vsub.f32 %v787_v22, %v170_v30  ;;  %v40_v49 = vsel %vm29_vm0, %v14_v45, 0  ;;  %v178_v51 = vand.u32 4294901760, %v821_v43 }
   0xc   :  { %v164_v37 = vand.u32 4294901760, %v163_v29  ;;  %725 = vmatpush.msra.mxu3 %v243_v34  ;;  %244 = vmatpush.msra.mxu1 %v243_v34  ;;  %v107_v47 = vsub.f32 %v804_v32, %v106_v38  ;;  %v841_v52 = vand.u32 4294901760, %v64_v46  ;;  %v114_v54 = vand.u32 4294901760, %v834_v48 }
   0xd   :  { %v100_v40 = vand.u32 4294901760, %v99_v36  ;;  %v172_v50 = vand.u32 4294901760, %v171_v42  ;;  %v848_v56 = vand.u32 4294901760, %v40_v49  ;;  %v179_v57 = vsub.f32 %v821_v43, %v178_v51 }
   0xe   :  { %165 = vmatmul.f32.vlgmr.msra.gmra.mxu2 %v164_v37  ;;  %726 = vmatpush.msra.mxu3 %v249_v35  ;;  %v108_v53 = vand.u32 4294901760, %v107_v47  ;;  %v855_v58 = vsub.f32 %v64_v46, %v841_v52  ;;  %v67_v60 = vsel %vm29_vm0, %v23_v55, 0  ;;  %v115_v61 = vsub.f32 %v834_v48, %v114_v54 }
   0xf   :  { %250 = vmatpush.msra.mxu1 %v249_v35  ;;  %284 = vmatmul.f32.vlgmr.msra.gmra.mxu3 %v765_v9  ;;  %v866_v62 = vsub.f32 %v40_v49, %v848_v56  ;;  %v43_v63 = vsel %vm29_vm0, %v15_v59, 0  ;;  %v180_v0 = vand.u32 4294901760, %v179_v57  ;;  %v871_v2 = vand.u32 4294901760, %v67_v60  ;;  %v17_v35 = vld [vmem:[%s1179_s1 + $0x30] sm:$0xff]  ;;  %v26_v49 = vld [vmem:[%s1179_s1 + $0x78] sm:$0xff] }
  0x10   :  { %101 = vmatmul.f32.vlgmr.msra.gmra.mxu0 %v100_v40  ;;  %432 = vmatpush.msrb.mxu3 %v751_v3  ;;  %v186_v1 = vand.u32 4294901760, %v855_v58  ;;  %v877_v6 = vand.u32 4294901760, %v43_v63  ;;  %v70_v11 = vsel %vm29_vm0, %v24_v5, 0  ;;  %v46_v14 = vsel %vm29_vm0, %v16_v10, 0  ;;  %v18_v57 = vld [vmem:[%s1179_s1 + $0x38] sm:$0xff] }
  0x11   :  { %252 = vmatmul.f32.vlgmr.msra.gmra.mxu1 %v778_v16  ;;  %v883_v8 = vsub.f32 %v67_v60, %v871_v2  ;;  %v899_v20 = vand.u32 4294901760, %v70_v11  ;;  %v905_v29 = vand.u32 4294901760, %v46_v14  ;;  %v73_v36 = vsel %vm29_vm0, %v25_v27, 0 }
  0x12   :  { %634 = vmatpush.msrb.mxu1 %v751_v3  ;;  %434 = vmatpush.msrb.mxu3 %v753_v4  ;;  %v116_v3 = vand.u32 4294901760, %v115_v61  ;;  %v187_v7 = vsub.f32 %v855_v58, %v186_v1  ;;  %v894_v13 = vsub.f32 %v43_v63, %v877_v6  ;;  %v49_v40 = vsel %vm29_vm0, %v17_v35, 0 }
  0x13   :  { %v194_v19 = vand.u32 4294901760, %v883_v8  ;;  %v911_v34 = vsub.f32 %v70_v11, %v899_v20  ;;  %v922_v39 = vsub.f32 %v46_v14, %v905_v29  ;;  %v927_v45 = vand.u32 4294901760, %v73_v36 }
  0x14   :  { %636 = vmatpush.msrb.mxu1 %v753_v4  ;;  %v122_v4 = vand.u32 4294901760, %v866_v62  ;;  %v188_v18 = vand.u32 4294901760, %v187_v7  ;;  %v130_v26 = vand.u32 4294901760, %v894_v13  ;;  %v76_v59 = vsel %vm29_vm0, %v26_v49, 0 }
  0x15   :  { %v195_v33 = vsub.f32 %v883_v8, %v194_v19  ;;  %v202_v42 = vand.u32 4294901760, %v911_v34  ;;  %v138_v47 = vand.u32 4294901760, %v922_v39  ;;  %v939_v55 = vsub.f32 %v73_v36, %v927_v45 }
  0x16   :  { %173 = vmatmul.f32.gmra.mxu2 %v172_v50  ;;  %v123_v12 = vsub.f32 %v866_v62, %v122_v4  ;;  %v131_v37 = vsub.f32 %v894_v13, %v130_v26  ;;  %v933_v50 = vand.u32 4294901760, %v49_v40  ;;  %v52_v63 = vsel %vm29_vm0, %v18_v57, 0 }
  0x17   :  { %288 = vmatmul.f32.gmra.mxu3 %v776_v15  ;;  %v196_v41 = vand.u32 4294901760, %v195_v33  ;;  %v139_v60 = vsub.f32 %v922_v39, %v138_v47  ;;  %v953_v5 = vand.u32 4294901760, %v76_v59  ;;  %v152_v11 = vand.u32 4294901760, %v52_v63 }
  0x18   :  { %109 = vmatmul.f32.gmra.mxu0 %v108_v53  ;;  %v124_v21 = vand.u32 4294901760, %v123_v12  ;;  %v132_v46 = vand.u32 4294901760, %v131_v37  ;;  %v203_v53 = vsub.f32 %v911_v34, %v202_v42  ;;  %v145_v61 = vsub.f32 %v49_v40, %v933_v50 }
  0x19   :  { %256 = vmatmul.f32.gmra.mxu1 %v794_v25  ;;  %v140_v7 = vand.u32 4294901760, %v139_v60  ;;  %v959_v14 = vsub.f32 %v76_v59, %v953_v5 }
  0x1a   :  { %v146_v10 = vand.u32 4294901760, %v145_v61 }
  0x1b   :  { %v218_v33 = vand.u32 4294901760, %v959_v14 }
  0x1d   :  { %v219_v37 = vsub.f32 %v959_v14, %v218_v33 }
  0x1e   :  { %181 = vmatmul.f32.gmra.mxu2 %v180_v0  ;;  %v204_v0 = vand.u32 4294901760, %v203_v53 }
  0x1f   :  { %292 = vmatmul.f32.gmra.mxu3 %v801_v31 }
  0x20   :  { %117 = vmatmul.f32.gmra.mxu0 %v116_v3  ;;  %v210_v3 = vand.u32 4294901760, %v939_v55 }
  0x21   :  { %260 = vmatmul.f32.gmra.mxu1 %v823_v44 }
  0x22   :  { %v211_v12 = vsub.f32 %v939_v55, %v210_v3 }
  0x24   :  { %v212_v27 = vand.u32 4294901760, %v211_v12 }
  0x26   :  { %189 = vmatmul.f32.gmra.mxu2 %v188_v18  ;;  %v147_v18 = vsub.f32 %v145_v61, %v146_v10 }
  0x27   :  { %296 = vmatmul.f32.gmra.mxu3 %v841_v52 }
  0x28   :  { %125 = vmatmul.f32.gmra.mxu0 %v124_v21  ;;  %v153_v21 = vsub.f32 %v52_v63, %v152_v11  ;;  %v148_v35 = vand.u32 4294901760, %v147_v18 }
  0x29   :  { %264 = vmatmul.f32.gmra.mxu1 %v848_v56 }
  0x2a   :  { %v154_v36 = vand.u32 4294901760, %v153_v21 }
  0x2c   :  { %v155_v40 = vsub.f32 %v153_v21, %v154_v36 }
  0x2e   :  { %197 = vmatmul.f32.gmra.mxu2 %v196_v41  ;;  %v220_v41 = vand.u32 4294901760, %v219_v37 }
  0x2f   :  { %300 = vmatmul.f32.gmra.mxu3 %v871_v2 }
  0x30   :  { %133 = vmatmul.f32.gmra.mxu0 %v132_v46  ;;  %v156_v46 = vand.u32 4294901760, %v155_v40 }
  0x31   :  { %268 = vmatmul.f32.gmra.mxu1 %v877_v6 }
  0x36   :  { %205 = vmatmul.f32.gmra.mxu2 %v204_v0 }
  0x37   :  { %304 = vmatmul.f32.gmra.mxu3 %v899_v20 }
  0x38   :  { %141 = vmatmul.f32.gmra.mxu0 %v140_v7 }
  0x39   :  { %272 = vmatmul.f32.gmra.mxu1 %v905_v29 }
  0x3e   :  { %213 = vmatmul.f32.gmra.mxu2 %v212_v27 }
  0x3f   :  { %308 = vmatmul.f32.gmra.mxu3 %v927_v45 }
  0x40   :  { %149 = vmatmul.f32.gmra.mxu0 %v148_v35 }
  0x41   :  { %276 = vmatmul.f32.gmra.mxu1 %v933_v50 }
  0x46   :  { %221 = vmatmul.f32.gmra.mxu2 %v220_v41 }
  0x47   :  { %312 = vmatmul.f32.gmra.mxu3 %v953_v5 }
  0x48   :  { %157 = vmatmul.f32.gmra.mxu0 %v156_v46 }
  0x49   :  { %280 = vmatmul.f32.gmra.mxu1 %v152_v11 }
  0x4e   :  { %338 = vmatmul.f32.vlgmr.msrb.gmra.mxu2 %v791_v23 }
  0x4f   :  { %438 = vmatmul.f32.vlgmr.msrb.gmra.mxu3 %v98_v28 }
  0x50   :  { %555 = vmatmul.f32.vlgmr.msrb.gmra.mxu0 %v778_v16 }
  0x51   :  { %638 = vmatmul.f32.vlgmr.msrb.gmra.mxu1 %v778_v16 }
  0x56   :  { %343 = vmatmul.f32.gmra.mxu2 %v804_v32 }
  0x57   :  { %444 = vmatmul.f32.gmra.mxu3 %v106_v38 }
  0x58   :  { %559 = vmatmul.f32.gmra.mxu0 %v794_v25 }
  0x59   :  { %642 = vmatmul.f32.gmra.mxu1 %v794_v25 }
  0x5e   :  { %348 = vmatmul.f32.gmra.mxu2 %v834_v48 }
  0x5f   :  { %450 = vmatmul.f32.gmra.mxu3 %v114_v54 }
  0x60   :  { %563 = vmatmul.f32.gmra.mxu0 %v823_v44 }
  0x61   :  { %646 = vmatmul.f32.gmra.mxu1 %v823_v44 }
  0x66   :  { %353 = vmatmul.f32.gmra.mxu2 %v866_v62 }
  0x67   :  { %456 = vmatmul.f32.gmra.mxu3 %v122_v4 }
  0x68   :  { %567 = vmatmul.f32.gmra.mxu0 %v848_v56 }
  0x69   :  { %650 = vmatmul.f32.gmra.mxu1 %v848_v56 }
  0x6e   :  { %358 = vmatmul.f32.gmra.mxu2 %v894_v13 }
  0x6f   :  { %462 = vmatmul.f32.gmra.mxu3 %v130_v26 }
  0x70   :  { %571 = vmatmul.f32.gmra.mxu0 %v877_v6 }
  0x71   :  { %654 = vmatmul.f32.gmra.mxu1 %v877_v6 }
  0x76   :  { %363 = vmatmul.f32.gmra.mxu2 %v922_v39 }
  0x77   :  { %468 = vmatmul.f32.gmra.mxu3 %v138_v47 }
  0x78   :  { %575 = vmatmul.f32.gmra.mxu0 %v905_v29 }
  0x79   :  { %658 = vmatmul.f32.gmra.mxu1 %v905_v29 }
  0x7e   :  { %368 = vmatmul.f32.gmra.mxu2 %v145_v61 }
  0x7f   :  { %474 = vmatmul.f32.gmra.mxu3 %v146_v10 }
  0x80   :  { %579 = vmatmul.f32.gmra.mxu0 %v933_v50 }
  0x81   :  { %662 = vmatmul.f32.gmra.mxu1 %v933_v50 }
  0x86   :  { %373 = vmatmul.f32.gmra.mxu2 %v153_v21 }
  0x87   :  { %480 = vmatmul.f32.gmra.mxu3 %v154_v36 }
  0x88   :  { %583 = vmatmul.f32.gmra.mxu0 %v152_v11 }
  0x89   :  { %666 = vmatmul.f32.gmra.mxu1 %v152_v11 }
  0x8d   :  { %v1002_v16 = vpop.f32.mrf.mxu0 }
  0x8e   :  { %378 = vmatmul.f32.gmra.mxu2 %v781_v17  ;;  %v1005_v23 = vpop.f32.mrf.mxu1 }
  0x8f   :  { %486 = vmatmul.f32.gmra.mxu3 %v162_v24  ;;  %v254_v59 = vadd.f32 %v1005_v23, %v1002_v16 }
  0x90   :  { %587 = vmatmul.f32.gmra.mxu0 %v765_v9 }
  0x91   :  { %v166_v25 = vpop.f32.mrf.mxu2  ;;  %670 = vmatmul.f32.gmra.mxu1 %v765_v9 }
  0x92   :  { %v285_v28 = vpop.f32.mrf.mxu3 }
  0x93   :  { %v1011_v32 = vadd.f32 %v285_v28, %v166_v25 }
  0x95   :  { %v1013_v38 = vpop.f32.mrf.mxu0 }
  0x96   :  { %383 = vmatmul.f32.gmra.mxu2 %v787_v22  ;;  %v1016_v44 = vpop.f32.mrf.mxu1 }
  0x97   :  { %492 = vmatmul.f32.gmra.mxu3 %v170_v30  ;;  %v258_v11 = vadd.f32 %v1016_v44, %v1013_v38 }
  0x98   :  { %591 = vmatmul.f32.gmra.mxu0 %v776_v15 }
  0x99   :  { %v174_v17 = vpop.f32.mrf.mxu2  ;;  %674 = vmatmul.f32.gmra.mxu1 %v776_v15 }
  0x9a   :  { %v289_v24 = vpop.f32.mrf.mxu3 }
  0x9b   :  { %v1022_v48 = vadd.f32 %v289_v24, %v174_v17 }
  0x9d   :  { %v1024_v9 = vpop.f32.mrf.mxu0 }
  0x9e   :  { %388 = vmatmul.f32.gmra.mxu2 %v821_v43  ;;  %v1027_v54 = vpop.f32.mrf.mxu1 }
  0x9f   :  { %498 = vmatmul.f32.gmra.mxu3 %v178_v51  ;;  %v262_v36 = vadd.f32 %v1027_v54, %v1024_v9 }
  0xa0   :  { %595 = vmatmul.f32.gmra.mxu0 %v801_v31 }
  0xa1   :  { %v182_v22 = vpop.f32.mrf.mxu2  ;;  %678 = vmatmul.f32.gmra.mxu1 %v801_v31 }
  0xa2   :  { %v293_v30 = vpop.f32.mrf.mxu3 }
  0xa3   :  { %v1033_v56 = vadd.f32 %v293_v30, %v182_v22 }
  0xa5   :  { %v1035_v15 = vpop.f32.mrf.mxu0 }
  0xa6   :  { %393 = vmatmul.f32.gmra.mxu2 %v855_v58  ;;  %v1038_v62 = vpop.f32.mrf.mxu1 }
  0xa7   :  { %504 = vmatmul.f32.gmra.mxu3 %v186_v1  ;;  %v266_v38 = vadd.f32 %v1038_v62, %v1035_v15 }
  0xa8   :  { %599 = vmatmul.f32.gmra.mxu0 %v841_v52 }
  0xa9   :  { %v190_v43 = vpop.f32.mrf.mxu2  ;;  %682 = vmatmul.f32.gmra.mxu1 %v841_v52 }
  0xaa   :  { %v297_v51 = vpop.f32.mrf.mxu3 }
  0xab   :  { %v1044_v4 = vadd.f32 %v297_v51, %v190_v43 }
  0xad   :  { %v1046_v31 = vpop.f32.mrf.mxu0 }
  0xae   :  { %398 = vmatmul.f32.gmra.mxu2 %v883_v8  ;;  %v1049_v6 = vpop.f32.mrf.mxu1 }
  0xaf   :  { %510 = vmatmul.f32.gmra.mxu3 %v194_v19  ;;  %v270_v51 = vadd.f32 %v1049_v6, %v1046_v31 }
  0xb0   :  { %603 = vmatmul.f32.gmra.mxu0 %v871_v2 }
  0xb1   :  { %v198_v58 = vpop.f32.mrf.mxu2  ;;  %686 = vmatmul.f32.gmra.mxu1 %v871_v2 }
  0xb2   :  { %v301_v1 = vpop.f32.mrf.mxu3 }
  0xb3   :  { %v1055_v13 = vadd.f32 %v301_v1, %v198_v58 }
  0xb5   :  { %v1057_v52 = vpop.f32.mrf.mxu0 }
  0xb6   :  { %403 = vmatmul.f32.gmra.mxu2 %v911_v34  ;;  %v1060_v26 = vpop.f32.mrf.mxu1 }
  0xb7   :  { %516 = vmatmul.f32.gmra.mxu3 %v202_v42 }
  0xb8   :  { %607 = vmatmul.f32.gmra.mxu0 %v899_v20 }
  0xb9   :  { %v206_v8 = vpop.f32.mrf.mxu2  ;;  %690 = vmatmul.f32.gmra.mxu1 %v899_v20 }
  0xba   :  { %v305_v19 = vpop.f32.mrf.mxu3 }
  0xbb   :  { %v1066_v29 = vadd.f32 %v305_v19, %v206_v8 }
  0xbd   :  { %v1068_v2 = vpop.f32.mrf.mxu0 }
  0xbe   :  { %408 = vmatmul.f32.gmra.mxu2 %v939_v55  ;;  %v1071_v39 = vpop.f32.mrf.mxu1 }
  0xbf   :  { %522 = vmatmul.f32.gmra.mxu3 %v210_v3 }
  0xc0   :  { %611 = vmatmul.f32.gmra.mxu0 %v927_v45 }
  0xc1   :  { %v214_v34 = vpop.f32.mrf.mxu2  ;;  %694 = vmatmul.f32.gmra.mxu1 %v927_v45 }
  0xc2   :  { %v309_v42 = vpop.f32.mrf.mxu3 }
  0xc3   :  { %v1077_v47 = vadd.f32 %v309_v42, %v214_v34 }
  0xc5   :  { %v1079_v20 = vpop.f32.mrf.mxu0 }
  0xc6   :  { %413 = vmatmul.f32.gmra.mxu2 %v959_v14  ;;  %v1082_v49 = vpop.f32.mrf.mxu1 }
  0xc7   :  { %528 = vmatmul.f32.gmra.mxu3 %v218_v33 }
  0xc8   :  { %615 = vmatmul.f32.gmra.mxu0 %v953_v5 }
  0xc9   :  { %v222_v50 = vpop.f32.mrf.mxu2  ;;  %698 = vmatmul.f32.gmra.mxu1 %v953_v5 }
  0xca   :  { %v313_v53 = vpop.f32.mrf.mxu3 }
  0xcb   :  { %v1088_v55 = vadd.f32 %v313_v53, %v222_v50  ;;  %v274_v50 = vadd.f32 %v1060_v26, %v1057_v52 }
  0xcd   :  { %v556_v45 = vpop.f32.mrf.mxu0 }
  0xce   :  { %v639_v57 = vpop.f32.mrf.mxu1 }
  0xd1   :  { %v339_v60 = vpop.f32.mrf.mxu2 }
  0xd2   :  { %v340_v61 = vadd.f32 %v339_v60, %v254_v59  ;;  %v439_v63 = vpop.f32.mrf.mxu3 }
  0xd4   :  { %v440_v0 = vadd.f32 %v439_v63, %v340_v61  ;;  %v278_v63 = vadd.f32 %v1071_v39, %v1068_v2 }
  0xd5   :  { %v560_v3 = vpop.f32.mrf.mxu0 }
  0xd6   :  { %v557_v7 = vadd.f32 %v556_v45, %v440_v0  ;;  %v643_v10 = vpop.f32.mrf.mxu1 }
  0xd8   :  { %v640_v5 = vadd.f32 %v639_v57, %v557_v7 }
  0xd9   :  { %v344_v12 = vpop.f32.mrf.mxu2 }
  0xda   :  { %703 = vst.msk [vmem:[%s1180_s2] sm:$0xff] %vm702_vm1, %v640_v5  ;;  %v345_v14 = vadd.f32 %v344_v12, %v258_v11  ;;  %v445_v18 = vpop.f32.mrf.mxu3  ;;  %v282_v12 = vadd.f32 %v1082_v49, %v1079_v20 }
  0xdc   :  { %v446_v21 = vadd.f32 %v445_v18, %v345_v14 }
  0xdd   :  { %v564_v27 = vpop.f32.mrf.mxu0 }
  0xde   :  { %v561_v33 = vadd.f32 %v560_v3, %v446_v21  ;;  %v647_v35 = vpop.f32.mrf.mxu1 }
  0xe0   :  { %v644_v37 = vadd.f32 %v643_v10, %v561_v33 }
  0xe1   :  { %v349_v40 = vpop.f32.mrf.mxu2 }
  0xe2   :  { %704 = vst.msk [vmem:[%s1180_s2 + $0x8] sm:$0xff] %vm702_vm1, %v644_v37  ;;  %v350_v41 = vadd.f32 %v349_v40, %v262_v36  ;;  %v451_v46 = vpop.f32.mrf.mxu3 }
  0xe4   :  { %v452_v16 = vadd.f32 %v451_v46, %v350_v41 }
  0xe5   :  { %v568_v23 = vpop.f32.mrf.mxu0 }
  0xe6   :  { %v565_v25 = vadd.f32 %v564_v27, %v452_v16  ;;  %v651_v28 = vpop.f32.mrf.mxu1 }
  0xe8   :  { %v648_v44 = vadd.f32 %v647_v35, %v565_v25 }
  0xe9   :  { %v354_v17 = vpop.f32.mrf.mxu2 }
  0xea   :  { %705 = vst.msk [vmem:[%s1180_s2 + $0x10] sm:$0xff] %vm702_vm1, %v648_v44  ;;  %v355_v24 = vadd.f32 %v354_v17, %v266_v38  ;;  %v457_v9 = vpop.f32.mrf.mxu3 }
  0xec   :  { %v458_v54 = vadd.f32 %v457_v9, %v355_v24 }
  0xed   :  { %v572_v22 = vpop.f32.mrf.mxu0 }
  0xee   :  { %v569_v30 = vadd.f32 %v568_v23, %v458_v54  ;;  %v655_v43 = vpop.f32.mrf.mxu1 }
  0xf0   :  { %v652_v58 = vadd.f32 %v651_v28, %v569_v30 }
  0xf1   :  { %v359_v1 = vpop.f32.mrf.mxu2 }
  0xf2   :  { %706 = vst.msk [vmem:[%s1180_s2 + $0x18] sm:$0xff] %vm702_vm1, %v652_v58  ;;  %v360_v15 = vadd.f32 %v359_v1, %v270_v51  ;;  %v463_v62 = vpop.f32.mrf.mxu3 }
  0xf4   :  { %v464_v8 = vadd.f32 %v463_v62, %v360_v15 }
  0xf5   :  { %v576_v19 = vpop.f32.mrf.mxu0 }
  0xf6   :  { %v573_v34 = vadd.f32 %v572_v22, %v464_v8  ;;  %v659_v42 = vpop.f32.mrf.mxu1 }
  0xf8   :  { %v656_v53 = vadd.f32 %v655_v43, %v573_v34 }
  0xf9   :  { %v364_v45 = vpop.f32.mrf.mxu2 }
  0xfa   :  { %707 = vst.msk [vmem:[%s1180_s2 + $0x20] sm:$0xff] %vm702_vm1, %v656_v53  ;;  %v365_v31 = vadd.f32 %v364_v45, %v274_v50  ;;  %v469_v6 = vpop.f32.mrf.mxu3 }
  0xfc   :  { %v470_v57 = vadd.f32 %v469_v6, %v365_v31 }
  0xfd   :  { %v580_v59 = vpop.f32.mrf.mxu0 }
  0xfe   :  { %v577_v60 = vadd.f32 %v576_v19, %v470_v57  ;;  %v663_v61 = vpop.f32.mrf.mxu1 }
 0x100   :  { %v660_v0 = vadd.f32 %v659_v42, %v577_v60 }
 0x101   :  { %v369_v3 = vpop.f32.mrf.mxu2 }
 0x102   :  { %708 = vst.msk [vmem:[%s1180_s2 + $0x28] sm:$0xff] %vm702_vm1, %v660_v0  ;;  %v370_v52 = vadd.f32 %v369_v3, %v278_v63  ;;  %v475_v26 = vpop.f32.mrf.mxu3 }
 0x104   :  { %v476_v7 = vadd.f32 %v475_v26, %v370_v52 }
 0x105   :  { %v584_v10 = vpop.f32.mrf.mxu0 }
 0x106   :  { %v581_v11 = vadd.f32 %v580_v59, %v476_v7  ;;  %v667_v5 = vpop.f32.mrf.mxu1 }
 0x108   :  { %v664_v14 = vadd.f32 %v663_v61, %v581_v11 }
 0x109   :  { %v374_v18 = vpop.f32.mrf.mxu2 }
 0x10a   :  { %709 = vst.msk [vmem:[%s1180_s2 + $0x30] sm:$0xff] %vm702_vm1, %v664_v14  ;;  %v375_v2 = vadd.f32 %v374_v18, %v282_v12  ;;  %v481_v39 = vpop.f32.mrf.mxu3 }
 0x10c   :  { %v482_v21 = vadd.f32 %v481_v39, %v375_v2 }
 0x10d   :  { %v588_v27 = vpop.f32.mrf.mxu0 }
 0x10e   :  { %v585_v33 = vadd.f32 %v584_v10, %v482_v21  ;;  %v671_v35 = vpop.f32.mrf.mxu1 }
 0x110   :  { %v668_v36 = vadd.f32 %v667_v5, %v585_v33 }
 0x111   :  { %v379_v37 = vpop.f32.mrf.mxu2 }
 0x112   :  { %710 = vst.msk [vmem:[%s1180_s2 + $0x38] sm:$0xff] %vm702_vm1, %v668_v36  ;;  %v380_v20 = vadd.f32 %v379_v37, %v1011_v32  ;;  %v487_v49 = vpop.f32.mrf.mxu3 }
 0x114   :  { %v488_v40 = vadd.f32 %v487_v49, %v380_v20 }
 0x115   :  { %v592_v41 = vpop.f32.mrf.mxu0 }
 0x116   :  { %v589_v46 = vadd.f32 %v588_v27, %v488_v40  ;;  %v675_v16 = vpop.f32.mrf.mxu1 }
 0x118   :  { %v672_v23 = vadd.f32 %v671_v35, %v589_v46 }
 0x119   :  { %v384_v25 = vpop.f32.mrf.mxu2 }
 0x11a   :  { %711 = vst.msk [vmem:[%s1180_s2 + $0x40] sm:$0xff] %vm702_vm1, %v672_v23  ;;  %v385_v28 = vadd.f32 %v384_v25, %v1022_v48  ;;  %v493_v38 = vpop.f32.mrf.mxu3 }
 0x11c   :  { %v494_v44 = vadd.f32 %v493_v38, %v385_v28 }
 0x11d   :  { %v596_v17 = vpop.f32.mrf.mxu0 }
 0x11e   :  { %v593_v24 = vadd.f32 %v592_v41, %v494_v44  ;;  %v679_v9 = vpop.f32.mrf.mxu1 }
 0x120   :  { %v676_v32 = vadd.f32 %v675_v16, %v593_v24 }
 0x121   :  { %v389_v54 = vpop.f32.mrf.mxu2 }
 0x122   :  { %712 = vst.msk [vmem:[%s1180_s2 + $0x48] sm:$0xff] %vm702_vm1, %v676_v32  ;;  %v390_v22 = vadd.f32 %v389_v54, %v1033_v56  ;;  %v499_v30 = vpop.f32.mrf.mxu3 }
 0x124   :  { %v500_v43 = vadd.f32 %v499_v30, %v390_v22 }
 0x125   :  { %v600_v51 = vpop.f32.mrf.mxu0 }
 0x126   :  { %v597_v58 = vadd.f32 %v596_v17, %v500_v43  ;;  %v683_v1 = vpop.f32.mrf.mxu1 }
 0x128   :  { %v680_v48 = vadd.f32 %v679_v9, %v597_v58 }
 0x129   :  { %v394_v15 = vpop.f32.mrf.mxu2 }
 0x12a   :  { %713 = vst.msk [vmem:[%s1180_s2 + $0x50] sm:$0xff] %vm702_vm1, %v680_v48  ;;  %v395_v62 = vadd.f32 %v394_v15, %v1044_v4  ;;  %v505_v8 = vpop.f32.mrf.mxu3 }
 0x12c   :  { %v506_v19 = vadd.f32 %v505_v8, %v395_v62 }
 0x12d   :  { %v604_v34 = vpop.f32.mrf.mxu0 }
 0x12e   :  { %v601_v42 = vadd.f32 %v600_v51, %v506_v19  ;;  %v687_v50 = vpop.f32.mrf.mxu1 }
 0x130   :  { %v684_v56 = vadd.f32 %v683_v1, %v601_v42 }
 0x131   :  { %v399_v53 = vpop.f32.mrf.mxu2 }
 0x132   :  { %714 = vst.msk [vmem:[%s1180_s2 + $0x58] sm:$0xff] %vm702_vm1, %v684_v56  ;;  %v400_v45 = vadd.f32 %v399_v53, %v1055_v13  ;;  %v511_v31 = vpop.f32.mrf.mxu3 }
 0x134   :  { %v512_v6 = vadd.f32 %v511_v31, %v400_v45 }
 0x135   :  { %v608_v59 = vpop.f32.mrf.mxu0 }
 0x136   :  { %v605_v57 = vadd.f32 %v604_v34, %v512_v6  ;;  %v691_v61 = vpop.f32.mrf.mxu1 }
 0x138   :  { %v688_v60 = vadd.f32 %v687_v50, %v605_v57 }
 0x139   :  { %v404_v4 = vpop.f32.mrf.mxu2 }
 0x13a   :  { %715 = vst.msk [vmem:[%s1180_s2 + $0x60] sm:$0xff] %vm702_vm1, %v688_v60  ;;  %v405_v63 = vadd.f32 %v404_v4, %v1066_v29  ;;  %v517_v0 = vpop.f32.mrf.mxu3 }
 0x13c   :  { %v518_v3 = vadd.f32 %v517_v0, %v405_v63 }
 0x13d   :  { %v612_v13 = vpop.f32.mrf.mxu0 }
 0x13e   :  { %v609_v52 = vadd.f32 %v608_v59, %v518_v3  ;;  %v695_v5 = vpop.f32.mrf.mxu1 }
 0x140   :  { %v692_v26 = vadd.f32 %v691_v61, %v609_v52 }
 0x141   :  { %v409_v7 = vpop.f32.mrf.mxu2 }
 0x142   :  { %716 = vst.msk [vmem:[%s1180_s2 + $0x68] sm:$0xff] %vm702_vm1, %v692_v26  ;;  %v410_v10 = vadd.f32 %v409_v7, %v1077_v47  ;;  %v523_v11 = vpop.f32.mrf.mxu3 }
 0x144   :  { %v524_v12 = vadd.f32 %v523_v11, %v410_v10 }
 0x145   :  { %v616_v21 = vpop.f32.mrf.mxu0 }
 0x146   :  { %v613_v14 = vadd.f32 %v612_v13, %v524_v12  ;;  %v699_v33 = vpop.f32.mrf.mxu1 }
 0x148   :  { %v696_v18 = vadd.f32 %v695_v5, %v613_v14 }
 0x149   :  { %v414_v2 = vpop.f32.mrf.mxu2 }
 0x14a   :  { %717 = vst.msk [vmem:[%s1180_s2 + $0x70] sm:$0xff] %vm702_vm1, %v696_v18  ;;  %v415_v29 = vadd.f32 %v414_v2, %v1088_v55  ;;  %v529_v39 = vpop.f32.mrf.mxu3 }
 0x14c   :  { %v530_v27 = vadd.f32 %v529_v39, %v415_v29 }
 0x14e   :  { %v617_v35 = vadd.f32 %v616_v21, %v530_v27 }
 0x150   :  { %v700_v36 = vadd.f32 %v699_v33, %v617_v35 }
 0x152   :  { %718 = vst.msk [vmem:[%s1180_s2 + $0x78] sm:$0xff] %vm702_vm1, %v700_v36 }

</bundles_post_ra>
